<compile_context>
chip_gen: v6e
topology: v6e:2x2x1
jax: 0.10.0
libtpu: 0.0.40
codegen_flags: <defaults>
</compile_context>

<pallas_src>
import functools

import jax
import jax.numpy as jnp
import numpy as np
from jax.experimental import pallas as pl
from jax.experimental.pallas import tpu as pltpu


# ---------------------------------------------------------------------------
# Parameter initialisation (glorot_orthogonal, deterministic via PRNGKey)
# ---------------------------------------------------------------------------
def glorot_orthogonal(key, shape, scale=2.0):
    """JAX equivalent of the torch glorot_orthogonal init (shape = [out, in])."""
    w = jax.nn.initializers.orthogonal()(key, shape, jnp.float32)
    fan = shape[-2] + shape[-1]
    s = scale / (fan * jnp.var(w))
    return w * jnp.sqrt(s)


def _round_up(v, m):
    return ((v + m - 1) // m) * m


# ---------------------------------------------------------------------------
# Kernel
# ---------------------------------------------------------------------------
def _output_pp_kernel(chunk_idx_ref, n_chunks_ref,              # SMEM scalar prefetch
                      idx_ref, x_ref, rbf_ref,                  # per-edge-chunk inputs
                      wrbf_ref, wup_ref, wl_ref, bl_ref, wout_ref,  # resident weights
                      out_ref,                                  # [tile_n, OC_pad] f32
                      acc_ref,                                  # scratch [tile_n, H] f32
                      *, num_layers, tile_n, compute_dtype):
    i = pl.program_id(0)           # node-tile index   ("parallel")
    c = pl.program_id(1)           # edge-chunk index  ("arbitrary" reduction)

    @pl.when(c == 0)
    def _init():
        acc_ref[...] = jnp.zeros_like(acc_ref)

    # ---- edge stage: rbf gate + tile-local segmented scatter (both on MXU) ----
    @pl.when(c < n_chunks_ref[i])
    def _accumulate():
        # rbf/x arrive in bf16 (streamed); accumulate in f32 on the MXU.
        h = jnp.dot(rbf_ref[...], wrbf_ref[...],
                    preferred_element_type=jnp.float32)                   # [tE, H] f32
        h = h * x_ref[...].astype(jnp.float32)                            # gate, f32 VPU

        # One-hot scatter: fold the scalar node-tile offset into the cheap
        # [1, tile_e] side; the [tile_n, tile_e] iota is loop-invariant.
        local_ids = idx_ref[...] - i * tile_n                             # [1, tE] i32
        node_iota = jax.lax.broadcasted_iota(
            jnp.int32, (tile_n, local_ids.shape[1]), 0)                   # [tN, tE]
        onehot = (node_iota == local_ids).astype(compute_dtype)           # exact 0/1
        acc_ref[...] += jnp.dot(onehot, h.astype(compute_dtype),
                                preferred_element_type=jnp.float32)       # [tN, H]

    # ---- node stage: lin_up -> L x swish(lin) -> lin (lane-padded output) ----
    @pl.when(c == pl.num_programs(1) - 1)
    def _finalize():
        xs = acc_ref[...].astype(compute_dtype)                           # [tN, H]
        y = jnp.dot(xs, wup_ref[...], preferred_element_type=jnp.float32)
        for l in range(num_layers):
            z = jnp.dot(y.astype(compute_dtype), wl_ref[l],
                        preferred_element_type=jnp.float32) + bl_ref[l]
            y = z * jax.nn.sigmoid(z)     # swish in f32 (portable: v5e has no bf16 VPU/EUP)
        out_ref[...] = jnp.dot(y.astype(compute_dtype), wout_ref[...],
                               preferred_element_type=jnp.float32
                               ).astype(out_ref.dtype)


# ---------------------------------------------------------------------------
# Hoisted (per-model) weight layout prep: transpose + pad + bf16-cast once.
# ---------------------------------------------------------------------------
def prepare_params(params, *, num_layers, compute_dtype=jnp.bfloat16,
                   r_pad=8, oc_pad=128):
    hidden = params["w_rbf"].shape[0]
    num_radial = params["w_rbf"].shape[1]
    out_emb = params["w_up"].shape[0]
    out_ch = params["w_out"].shape[0]

    wrbf_t = (jnp.zeros((r_pad, hidden), jnp.float32)
              .at[:num_radial].set(params["w_rbf"].T)).astype(compute_dtype)
    wup_t = params["w_up"].T.astype(compute_dtype)                           # [H, OE]
    wl_t = jnp.transpose(params["w_lins"], (0, 2, 1)).astype(compute_dtype)  # [L,OE,OE]
    bl = params["b_lins"].reshape(num_layers, 1, out_emb).astype(jnp.float32)
    wout_t = (jnp.zeros((out_emb, oc_pad), jnp.float32)
              .at[:, :out_ch].set(params["w_out"].T)).astype(compute_dtype)

    return dict(wrbf_t=wrbf_t, wup_t=wup_t, wl_t=wl_t, bl=bl, wout_t=wout_t,
                hidden=hidden, out_emb=out_emb, out_ch=out_ch,
                num_radial=num_radial, r_pad=r_pad, oc_pad=oc_pad)


# ---------------------------------------------------------------------------
# Per-static-graph edge schedule (the ONLY host sync; cache & reuse across calls).
# Sort edges by destination node, map each node tile to the contiguous set of
# edge blocks that hold its edges, pad the schedule with repeated block indices
# so skipped reduction steps never trigger a fresh DMA.
# ---------------------------------------------------------------------------
def build_edge_schedule(idx, num_nodes, *, tile_n=128, tile_e=1024):
    assert tile_e % 128 == 0 and tile_n % 8 == 0
    e = int(idx.shape[0])
    n_pad = _round_up(max(int(num_nodes), tile_n), tile_n)
    e_pad = _round_up(max(e, tile_e), tile_e)
    num_node_tiles = n_pad // tile_n

    idx_host = np.asarray(jax.device_get(idx), np.int32)
    order = np.argsort(idx_host, kind="stable")
    idx_sorted = idx_host[order]
    # padded edges get a sentinel destination >= every in-kernel node id
    idx_sorted_pad = np.concatenate(
        [idx_sorted, np.full((e_pad - e,), n_pad, np.int32)]).astype(np.int32)

    chunk_lists, n_chunks = [], []
    for t in range(num_node_tiles):
        lo = int(np.searchsorted(idx_sorted_pad, t * tile_n, side="left"))
        hi = int(np.searchsorted(idx_sorted_pad, (t + 1) * tile_n, side="left"))
        blocks = list(range(lo // tile_e, -(-hi // tile_e))) if hi > lo else []
        chunk_lists.append(blocks)
        n_chunks.append(len(blocks))
    max_chunks = max(1, max(n_chunks))

    # Pad each tile's schedule with its last valid block index (carried forward
    # across empty tiles): skipped steps keep the same block index -> no re-DMA.
    chunk_idx = np.zeros((num_node_tiles, max_chunks), np.int32)
    prev = 0
    for t, blocks in enumerate(chunk_lists):
        if blocks:
            chunk_idx[t, :len(blocks)] = np.asarray(blocks, np.int32)
            prev = blocks[-1]
        chunk_idx[t, len(blocks):] = prev

    return dict(
        order=jnp.asarray(order, jnp.int32),
        idx_sorted=jnp.asarray(idx_sorted_pad, jnp.int32).reshape(1, e_pad),
        chunk_idx=jnp.asarray(chunk_idx),
        n_chunks=jnp.asarray(np.asarray(n_chunks, np.int32)),
        max_chunks=int(max_chunks), n_pad=int(n_pad), e_pad=int(e_pad),
        num_node_tiles=int(num_node_tiles), num_edges=e,
        tile_n=int(tile_n), tile_e=int(tile_e),
    )


# ---------------------------------------------------------------------------
# Wrapper (host-sync free; jittable given a prebuilt schedule + prepared params)
# ---------------------------------------------------------------------------
def output_pp_block(x, rbf, schedule, num_nodes, prep, *, num_layers,
                    compute_dtype=jnp.bfloat16,
                    vmem_limit_bytes=48 * 1024 * 1024):
    hidden, out_emb = prep["hidden"], prep["out_emb"]
    out_ch, r_pad, oc_pad = prep["out_ch"], prep["r_pad"], prep["oc_pad"]
    num_radial = prep["num_radial"]
    tile_n, tile_e = schedule["tile_n"], schedule["tile_e"]
    n_pad, e_pad = schedule["n_pad"], schedule["e_pad"]
    num_node_tiles, max_chunks = schedule["num_node_tiles"], schedule["max_chunks"]
    e = schedule["num_edges"]

    # Destination-sorted gather + pad, written directly in bf16 (halves both the
    # wrapper's write pass and the kernel's dominant HBM read stream).
    order = schedule["order"]
    x_s = jnp.zeros((e_pad, hidden), compute_dtype).at[:e].set(
        x[order].astype(compute_dtype))
    rbf_s = jnp.zeros((e_pad, r_pad), compute_dtype).at[:e, :num_radial].set(
        rbf[order].astype(compute_dtype))

    kernel = functools.partial(_output_pp_kernel, num_layers=num_layers,
                               tile_n=tile_n, compute_dtype=compute_dtype)

    # Advisory cost estimate for the XLA scheduler.
    flops = 2 * (e_pad * r_pad * hidden
                 + num_node_tiles * max_chunks * tile_n * tile_e * hidden
                 + n_pad * (hidden * out_emb + num_layers * out_emb * out_emb
                            + out_emb * oc_pad))
    bytes_accessed = (x_s.size * 2 + rbf_s.size * 2 + e_pad * 4
                      + n_pad * oc_pad * 4
                      + sum(int(np.prod(prep[k].shape)) * 2
                            for k in ("wrbf_t", "wup_t", "wl_t", "wout_t"))
                      + int(prep["bl"].size) * 4)
    cost = pl.CostEstimate(flops=int(flops),
                           transcendentals=int(n_pad * out_emb * num_layers),
                           bytes_accessed=int(bytes_accessed))

    grid_spec = pltpu.PrefetchScalarGridSpec(
        num_scalar_prefetch=2,                     # chunk_idx, n_chunks -> SMEM
        grid=(num_node_tiles, max_chunks),
        in_specs=[
            pl.BlockSpec((1, tile_e), lambda i, c, ci, nc: (0, ci[i, c])),       # idx
            pl.BlockSpec((tile_e, hidden), lambda i, c, ci, nc: (ci[i, c], 0)),  # x (bf16)
            pl.BlockSpec((tile_e, r_pad), lambda i, c, ci, nc: (ci[i, c], 0)),   # rbf (bf16)
            pl.BlockSpec((r_pad, hidden), lambda i, c, ci, nc: (0, 0)),          # W_rbf^T
            pl.BlockSpec((hidden, out_emb), lambda i, c, ci, nc: (0, 0)),        # W_up^T
            pl.BlockSpec((num_layers, out_emb, out_emb),
                         lambda i, c, ci, nc: (0, 0, 0)),                        # W_l^T
            pl.BlockSpec((num_layers, 1, out_emb),
                         lambda i, c, ci, nc: (0, 0, 0)),                        # b_l
            pl.BlockSpec((out_emb, oc_pad), lambda i, c, ci, nc: (0, 0)),        # W_out^T
        ],
        out_specs=pl.BlockSpec((tile_n, oc_pad), lambda i, c, ci, nc: (i, 0)),
        scratch_shapes=[pltpu.VMEM((tile_n, hidden), jnp.float32)],
    )

    out_padded = pl.pallas_call(
        kernel,
        out_shape=jax.ShapeDtypeStruct((n_pad, oc_pad), jnp.float32),
        grid_spec=grid_spec,
        compiler_params=pltpu.CompilerParams(
            dimension_semantics=("parallel", "arbitrary"),   # node axis -> 2 TCs on v7x
            vmem_limit_bytes=vmem_limit_bytes),
        cost_estimate=cost,
    )(schedule["chunk_idx"], schedule["n_chunks"],
      schedule["idx_sorted"], x_s, rbf_s,
      prep["wrbf_t"], prep["wup_t"], prep["wl_t"], prep["bl"], prep["wout_t"])

    return out_padded[:num_nodes, :out_ch]


# ---------------------------------------------------------------------------
# Pure-JAX reference mirroring the module formula (and the kernel's bf16
# streamed-input / f32-accumulate numerics) for the correctness check.
# ---------------------------------------------------------------------------
def reference_forward(x, rbf, idx, num_nodes, params, num_layers, compute_dtype):
    cd = compute_dtype

    def mm(a, b):
        return jnp.dot(a.astype(cd), b.astype(cd),
                       preferred_element_type=jnp.float32)

    x_r = x.astype(cd).astype(jnp.float32)     # edge features are streamed in bf16
    h = mm(rbf, params["w_rbf"].T) * x_r
    h = h.astype(cd).astype(jnp.float32)       # kernel rounds h before the scatter matmul
    xs = jax.ops.segment_sum(h, idx, num_segments=num_nodes)
    y = mm(xs, params["w_up"].T)
    for l in range(num_layers):
        z = mm(y, params["w_lins"][l].T) + params["b_lins"][l]
        y = z * jax.nn.sigmoid(z)
    return mm(y, params["w_out"].T)


if __name__ == "__main__":
    # Small graph, module-default channel sizes (already vreg/MXU aligned).
    E = 300            # number of edges
    N = 24             # num_nodes
    HIDDEN = 128       # hidden_channels
    OUT_EMB = 256      # out_emb_channels
    OUT_CH = 1         # out_channels
    NUM_RADIAL = 6
    NUM_LAYERS = 3
    TILE_N = 8         # tiny demo tiles (exercise multi-tile/multi-chunk paths);
    TILE_E = 128       # production: tile_n=128, tile_e=1024-2048
    COMPUTE_DTYPE = jnp.bfloat16   # MXU inputs / edge stream; accumulation stays f32

    key = jax.random.PRNGKey(0)
    keys = jax.random.split(key, 7 + NUM_LAYERS)

    bias_bound = 1.0 / (OUT_EMB ** 0.5)     # torch Linear default bias range
    params = {
        "w_rbf": glorot_orthogonal(keys[0], (HIDDEN, NUM_RADIAL)),
        "w_up": glorot_orthogonal(keys[1], (OUT_EMB, HIDDEN)),
        "w_lins": jnp.stack(
            [glorot_orthogonal(keys[2 + l], (OUT_EMB, OUT_EMB))
             for l in range(NUM_LAYERS)]),
        "b_lins": jax.random.uniform(keys[2 + NUM_LAYERS], (NUM_LAYERS, OUT_EMB),
                                     jnp.float32, -bias_bound, bias_bound),
        "w_out": glorot_orthogonal(keys[3 + NUM_LAYERS], (OUT_CH, OUT_EMB)),
    }

    x = jax.random.normal(keys[4 + NUM_LAYERS], (E, HIDDEN), jnp.float32)
    rbf = jax.random.normal(keys[5 + NUM_LAYERS], (E, NUM_RADIAL), jnp.float32)
    idx = jax.random.randint(keys[6 + NUM_LAYERS], (E,), 0, N, jnp.int32)

    prep = prepare_params(params, num_layers=NUM_LAYERS, compute_dtype=COMPUTE_DTYPE)
    # Host-side schedule build happens ONCE per static graph topology; the compute
    # path below is host-sync-free and jittable.
    schedule = build_edge_schedule(idx, N, tile_n=TILE_N, tile_e=TILE_E)

    fwd = jax.jit(lambda x_, rbf_: output_pp_block(
        x_, rbf_, schedule, N, prep, num_layers=NUM_LAYERS,
        compute_dtype=COMPUTE_DTYPE))
    out = jax.block_until_ready(fwd(x, rbf))

    ref = reference_forward(x, rbf, idx, N, params, NUM_LAYERS, COMPUTE_DTYPE)
    assert out.shape == (N, OUT_CH), out.shape
    assert jnp.allclose(out, ref, atol=1e-2, rtol=1e-2), (out, ref)

    print("KERNEL_OK")
</pallas_src>

<mosaic_0001>
module attributes {stable_mosaic.version = 11 : i64} {
  func.func @_output_pp_kernel(%arg0: i32, %arg1: i32, %arg2: memref<3x2xi32, #tpu.memory_space<smem>>, %arg3: memref<3xi32, #tpu.memory_space<smem>>, %arg4: memref<1x128xi32, #tpu.memory_space<vmem>>, %arg5: memref<128x128xbf16, #tpu.memory_space<vmem>>, %arg6: memref<128x8xbf16, #tpu.memory_space<vmem>>, %arg7: memref<8x128xbf16, #tpu.memory_space<vmem>>, %arg8: memref<128x256xbf16, #tpu.memory_space<vmem>>, %arg9: memref<3x256x256xbf16, #tpu.memory_space<vmem>>, %arg10: memref<3x1x256xf32, #tpu.memory_space<vmem>>, %arg11: memref<256x128xbf16, #tpu.memory_space<vmem>>, %arg12: memref<8x128xf32, #tpu.memory_space<vmem>>, %arg13: memref<8x128xf32, #tpu.memory_space<vmem>>) attributes {dimension_semantics = [#tpu.dimension_semantics<parallel>, #tpu.dimension_semantics<arbitrary>], iteration_bounds = array<i64: 3, 2>, scalar_prefetch = 2 : i64, scratch_operands = 1 : i64, tpu.core_type = #tpu.core_type<tc>, window_params = [{transform_indices = @transform_0, window_bounds = array<i64: 1, 128>}, {transform_indices = @transform_1, window_bounds = array<i64: 128, 128>}, {transform_indices = @transform_2, window_bounds = array<i64: 128, 8>}, {pipeline_mode = #tpu.pipeline_mode<synchronous>, transform_indices = @transform_3, window_bounds = array<i64: 8, 128>}, {pipeline_mode = #tpu.pipeline_mode<synchronous>, transform_indices = @transform_4, window_bounds = array<i64: 128, 256>}, {pipeline_mode = #tpu.pipeline_mode<synchronous>, transform_indices = @transform_5, window_bounds = array<i64: 3, 256, 256>}, {pipeline_mode = #tpu.pipeline_mode<synchronous>, transform_indices = @transform_6, window_bounds = array<i64: 3, 1, 256>}, {pipeline_mode = #tpu.pipeline_mode<synchronous>, transform_indices = @transform_7, window_bounds = array<i64: 256, 128>}, {transform_indices = @transform_8, window_bounds = array<i64: 8, 128>}]} {
    %c0_i32 = arith.constant 0 : i32
    %0 = arith.cmpi eq, %arg1, %c0_i32 : i32
    %1 = arith.extui %0 : i1 to i32
    %c0_i32_0 = arith.constant 0 : i32
    %2 = arith.cmpi ne, %1, %c0_i32_0 : i32
    scf.if %2 {
      %cst = arith.constant 0.000000e+00 : f32
      %11 = vector.broadcast %cst : f32 to vector<8x128xf32>
      %c0 = arith.constant 0 : index
      %c0_3 = arith.constant 0 : index
      %12 = vector.load %arg13[%c0, %c0_3] : memref<8x128xf32, #tpu.memory_space<vmem>>, vector<8x128xf32>
      tpu.vector_store %arg13[%c0, %c0_3], %11 {strides = array<i32>} : memref<8x128xf32, #tpu.memory_space<vmem>>, vector<8x128xf32>,
    } else {
    }
    %3 = arith.index_cast %arg0 : i32 to index
    %4 = memref.load %arg3[%3] : memref<3xi32, #tpu.memory_space<smem>>
    %5 = arith.cmpi slt, %arg1, %4 : i32
    %6 = arith.extui %5 : i1 to i32
    %c0_i32_1 = arith.constant 0 : i32
    %7 = arith.cmpi ne, %6, %c0_i32_1 : i32
    scf.if %7 {
      %c0 = arith.constant 0 : index
      %c0_3 = arith.constant 0 : index
      %11 = vector.load %arg6[%c0, %c0_3] : memref<128x8xbf16, #tpu.memory_space<vmem>>, vector<128x8xbf16>
      %c0_4 = arith.constant 0 : index
      %c0_5 = arith.constant 0 : index
      %12 = vector.load %arg7[%c0_4, %c0_5] : memref<8x128xbf16, #tpu.memory_space<vmem>>, vector<8x128xbf16>
      %cst = arith.constant dense<0.000000e+00> : vector<128x128xf32>
      %13 = tpu.matmul %11, %12, %cst {dimension_numbers = #tpu.dot_dimension_numbers<[1], [0], [0], [1], [0, 0, 1, 1], [], []>} : vector<128x8xbf16>, vector<8x128xbf16>, vector<128x128xf32> -> vector<128x128xf32>
      %c0_6 = arith.constant 0 : index
      %c0_7 = arith.constant 0 : index
      %14 = vector.load %arg5[%c0_6, %c0_7] : memref<128x128xbf16, #tpu.memory_space<vmem>>, vector<128x128xbf16>
      %15 = arith.extf %14 : vector<128x128xbf16> to vector<128x128xf32>
      %16 = arith.mulf %13, %15 : vector<128x128xf32>
      %c0_8 = arith.constant 0 : index
      %c0_9 = arith.constant 0 : index
      %17 = vector.load %arg4[%c0_8, %c0_9] : memref<1x128xi32, #tpu.memory_space<vmem>>, vector<1x128xi32>
      %c8_i32 = arith.constant 8 : i32
      %18 = arith.muli %arg0, %c8_i32 : i32
      %19 = vector.broadcast %18 : i32 to vector<1x128xi32>
      %20 = arith.subi %17, %19 : vector<1x128xi32>
      %21 = tpu.iota {dimensions = array<i32: 0>} : vector<8x128xi32>
      %22 = vector.broadcast %20 : vector<1x128xi32> to vector<8x128xi32>
      %23 = arith.cmpi eq, %21, %22 : vector<8x128xi32>
      %24 = arith.extui %23 : vector<8x128xi1> to vector<8x128xi32>
      %25 = arith.sitofp %24 : vector<8x128xi32> to vector<8x128xf32>
      %26 = arith.truncf %25 : vector<8x128xf32> to vector<8x128xbf16>
      %c0_10 = arith.constant 0 : index
      %c0_11 = arith.constant 0 : index
      %27 = vector.load %arg13[%c0_10, %c0_11] : memref<8x128xf32, #tpu.memory_space<vmem>>, vector<8x128xf32>
      %28 = arith.truncf %16 : vector<128x128xf32> to vector<128x128xbf16>
      %cst_12 = arith.constant dense<0.000000e+00> : vector<8x128xf32>
      %29 = tpu.matmul %26, %28, %cst_12 {dimension_numbers = #tpu.dot_dimension_numbers<[1], [0], [0], [1], [0, 0, 1, 1], [], []>} : vector<8x128xbf16>, vector<128x128xbf16>, vector<8x128xf32> -> vector<8x128xf32>
      %30 = arith.addf %27, %29 : vector<8x128xf32>
      %c0_13 = arith.constant 0 : index
      %c0_14 = arith.constant 0 : index
      %31 = vector.load %arg13[%c0_13, %c0_14] : memref<8x128xf32, #tpu.memory_space<vmem>>, vector<8x128xf32>
      tpu.vector_store %arg13[%c0_13, %c0_14], %30 {strides = array<i32>} : memref<8x128xf32, #tpu.memory_space<vmem>>, vector<8x128xf32>,
    } else {
    }
    %c1_i32 = arith.constant 1 : i32
    %8 = arith.cmpi eq, %arg1, %c1_i32 : i32
    %9 = arith.extui %8 : i1 to i32
    %c0_i32_2 = arith.constant 0 : i32
    %10 = arith.cmpi ne, %9, %c0_i32_2 : i32
    scf.if %10 {
      %c0 = arith.constant 0 : index
      %c0_3 = arith.constant 0 : index
      %11 = vector.load %arg13[%c0, %c0_3] : memref<8x128xf32, #tpu.memory_space<vmem>>, vector<8x128xf32>
      %12 = arith.truncf %11 : vector<8x128xf32> to vector<8x128xbf16>
      %c0_4 = arith.constant 0 : index
      %c0_5 = arith.constant 0 : index
      %13 = vector.load %arg8[%c0_4, %c0_5] : memref<128x256xbf16, #tpu.memory_space<vmem>>, vector<128x256xbf16>
      %cst = arith.constant dense<0.000000e+00> : vector<8x256xf32>
      %14 = tpu.matmul %12, %13, %cst {dimension_numbers = #tpu.dot_dimension_numbers<[1], [0], [0], [1], [0, 0, 1, 1], [], []>} : vector<8x128xbf16>, vector<128x256xbf16>, vector<8x256xf32> -> vector<8x256xf32>
      %15 = arith.truncf %14 : vector<8x256xf32> to vector<8x256xbf16>
      %c0_6 = arith.constant 0 : index
      %c0_7 = arith.constant 0 : index
      %c0_8 = arith.constant 0 : index
      %16 = vector.load %arg9[%c0_6, %c0_7, %c0_8] : memref<3x256x256xbf16, #tpu.memory_space<vmem>>, vector<1x256x256xbf16>
      %17 = vector.shape_cast %16 : vector<1x256x256xbf16> to vector<256x256xbf16>
      %cst_9 = arith.constant dense<0.000000e+00> : vector<8x256xf32>
      %18 = tpu.matmul %15, %17, %cst_9 {dimension_numbers = #tpu.dot_dimension_numbers<[1], [0], [0], [1], [0, 0, 1, 1], [], []>} : vector<8x256xbf16>, vector<256x256xbf16>, vector<8x256xf32> -> vector<8x256xf32>
      %c0_10 = arith.constant 0 : index
      %c0_11 = arith.constant 0 : index
      %c0_12 = arith.constant 0 : index
      %19 = vector.load %arg10[%c0_10, %c0_11, %c0_12] : memref<3x1x256xf32, #tpu.memory_space<vmem>>, vector<1x1x256xf32>
      %20 = vector.shape_cast %19 : vector<1x1x256xf32> to vector<1x256xf32>
      %21 = vector.broadcast %20 : vector<1x256xf32> to vector<8x256xf32>
      %22 = arith.addf %18, %21 : vector<8x256xf32>
      %23 = arith.negf %22 : vector<8x256xf32>
      %24 = math.exp %23 : vector<8x256xf32>
      %cst_13 = arith.constant 1.000000e+00 : f32
      %25 = vector.broadcast %cst_13 : f32 to vector<8x256xf32>
      %26 = arith.addf %25, %24 : vector<8x256xf32>
      %27 = arith.divf %25, %26 : vector<8x256xf32>
      %28 = arith.mulf %22, %27 : vector<8x256xf32>
      %29 = arith.truncf %28 : vector<8x256xf32> to vector<8x256xbf16>
      %c1 = arith.constant 1 : index
      %c0_14 = arith.constant 0 : index
      %c0_15 = arith.constant 0 : index
      %30 = vector.load %arg9[%c1, %c0_14, %c0_15] : memref<3x256x256xbf16, #tpu.memory_space<vmem>>, vector<1x256x256xbf16>
      %31 = vector.shape_cast %30 : vector<1x256x256xbf16> to vector<256x256xbf16>
      %cst_16 = arith.constant dense<0.000000e+00> : vector<8x256xf32>
      %32 = tpu.matmul %29, %31, %cst_16 {dimension_numbers = #tpu.dot_dimension_numbers<[1], [0], [0], [1], [0, 0, 1, 1], [], []>} : vector<8x256xbf16>, vector<256x256xbf16>, vector<8x256xf32> -> vector<8x256xf32>
      %c1_17 = arith.constant 1 : index
      %c0_18 = arith.constant 0 : index
      %c0_19 = arith.constant 0 : index
      %33 = vector.load %arg10[%c1_17, %c0_18, %c0_19] : memref<3x1x256xf32, #tpu.memory_space<vmem>>, vector<1x1x256xf32>
      %34 = vector.shape_cast %33 : vector<1x1x256xf32> to vector<1x256xf32>
      %35 = vector.broadcast %34 : vector<1x256xf32> to vector<8x256xf32>
      %36 = arith.addf %32, %35 : vector<8x256xf32>
      %37 = arith.negf %36 : vector<8x256xf32>
      %38 = math.exp %37 : vector<8x256xf32>
      %cst_20 = arith.constant 1.000000e+00 : f32
      %39 = vector.broadcast %cst_20 : f32 to vector<8x256xf32>
      %40 = arith.addf %39, %38 : vector<8x256xf32>
      %41 = arith.divf %39, %40 : vector<8x256xf32>
      %42 = arith.mulf %36, %41 : vector<8x256xf32>
      %43 = arith.truncf %42 : vector<8x256xf32> to vector<8x256xbf16>
      %c2 = arith.constant 2 : index
      %c0_21 = arith.constant 0 : index
      %c0_22 = arith.constant 0 : index
      %44 = vector.load %arg9[%c2, %c0_21, %c0_22] : memref<3x256x256xbf16, #tpu.memory_space<vmem>>, vector<1x256x256xbf16>
      %45 = vector.shape_cast %44 : vector<1x256x256xbf16> to vector<256x256xbf16>
      %cst_23 = arith.constant dense<0.000000e+00> : vector<8x256xf32>
      %46 = tpu.matmul %43, %45, %cst_23 {dimension_numbers = #tpu.dot_dimension_numbers<[1], [0], [0], [1], [0, 0, 1, 1], [], []>} : vector<8x256xbf16>, vector<256x256xbf16>, vector<8x256xf32> -> vector<8x256xf32>
      %c2_24 = arith.constant 2 : index
      %c0_25 = arith.constant 0 : index
      %c0_26 = arith.constant 0 : index
      %47 = vector.load %arg10[%c2_24, %c0_25, %c0_26] : memref<3x1x256xf32, #tpu.memory_space<vmem>>, vector<1x1x256xf32>
      %48 = vector.shape_cast %47 : vector<1x1x256xf32> to vector<1x256xf32>
      %49 = vector.broadcast %48 : vector<1x256xf32> to vector<8x256xf32>
      %50 = arith.addf %46, %49 : vector<8x256xf32>
      %51 = arith.negf %50 : vector<8x256xf32>
      %52 = math.exp %51 : vector<8x256xf32>
      %cst_27 = arith.constant 1.000000e+00 : f32
      %53 = vector.broadcast %cst_27 : f32 to vector<8x256xf32>
      %54 = arith.addf %53, %52 : vector<8x256xf32>
      %55 = arith.divf %53, %54 : vector<8x256xf32>
      %56 = arith.mulf %50, %55 : vector<8x256xf32>
      %57 = arith.truncf %56 : vector<8x256xf32> to vector<8x256xbf16>
      %c0_28 = arith.constant 0 : index
      %c0_29 = arith.constant 0 : index
      %58 = vector.load %arg11[%c0_28, %c0_29] : memref<256x128xbf16, #tpu.memory_space<vmem>>, vector<256x128xbf16>
      %cst_30 = arith.constant dense<0.000000e+00> : vector<8x128xf32>
      %59 = tpu.matmul %57, %58, %cst_30 {dimension_numbers = #tpu.dot_dimension_numbers<[1], [0], [0], [1], [0, 0, 1, 1], [], []>} : vector<8x256xbf16>, vector<256x128xbf16>, vector<8x128xf32> -> vector<8x128xf32>
      %c0_31 = arith.constant 0 : index
      %c0_32 = arith.constant 0 : index
      %60 = vector.load %arg12[%c0_31, %c0_32] : memref<8x128xf32, #tpu.memory_space<vmem>>, vector<8x128xf32>
      tpu.vector_store %arg12[%c0_31, %c0_32], %59 {strides = array<i32>} : memref<8x128xf32, #tpu.memory_space<vmem>>, vector<8x128xf32>,
    } else {
    }
    return
  }
  func.func @transform_0(%arg0: i32, %arg1: i32, %arg2: memref<3x2xi32, #tpu.memory_space<smem>>, %arg3: memref<3xi32, #tpu.memory_space<smem>>) -> (i32, i32) {
    %0 = arith.index_cast %arg0 : i32 to index
    %1 = arith.index_cast %arg1 : i32 to index
    %2 = memref.load %arg2[%0, %1] : memref<3x2xi32, #tpu.memory_space<smem>>
    %c0_i32 = arith.constant 0 : i32
    %c0_i32_0 = arith.constant 0 : i32
    return %c0_i32, %2 : i32, i32
  }
  func.func @transform_1(%arg0: i32, %arg1: i32, %arg2: memref<3x2xi32, #tpu.memory_space<smem>>, %arg3: memref<3xi32, #tpu.memory_space<smem>>) -> (i32, i32) {
    %0 = arith.index_cast %arg0 : i32 to index
    %1 = arith.index_cast %arg1 : i32 to index
    %2 = memref.load %arg2[%0, %1] : memref<3x2xi32, #tpu.memory_space<smem>>
    %c0_i32 = arith.constant 0 : i32
    %c0_i32_0 = arith.constant 0 : i32
    return %2, %c0_i32 : i32, i32
  }
  func.func @transform_2(%arg0: i32, %arg1: i32, %arg2: memref<3x2xi32, #tpu.memory_space<smem>>, %arg3: memref<3xi32, #tpu.memory_space<smem>>) -> (i32, i32) {
    %0 = arith.index_cast %arg0 : i32 to index
    %1 = arith.index_cast %arg1 : i32 to index
    %2 = memref.load %arg2[%0, %1] : memref<3x2xi32, #tpu.memory_space<smem>>
    %c0_i32 = arith.constant 0 : i32
    %c0_i32_0 = arith.constant 0 : i32
    return %2, %c0_i32 : i32, i32
  }
  func.func @transform_3(%arg0: i32, %arg1: i32, %arg2: memref<3x2xi32, #tpu.memory_space<smem>>, %arg3: memref<3xi32, #tpu.memory_space<smem>>) -> (i32, i32) {
    %c0_i32 = arith.constant 0 : i32
    %c0_i32_0 = arith.constant 0 : i32
    %c0_i32_1 = arith.constant 0 : i32
    return %c0_i32, %c0_i32_0 : i32, i32
  }
  func.func @transform_4(%arg0: i32, %arg1: i32, %arg2: memref<3x2xi32, #tpu.memory_space<smem>>, %arg3: memref<3xi32, #tpu.memory_space<smem>>) -> (i32, i32) {
    %c0_i32 = arith.constant 0 : i32
    %c0_i32_0 = arith.constant 0 : i32
    %c0_i32_1 = arith.constant 0 : i32
    return %c0_i32, %c0_i32_0 : i32, i32
  }
  func.func @transform_5(%arg0: i32, %arg1: i32, %arg2: memref<3x2xi32, #tpu.memory_space<smem>>, %arg3: memref<3xi32, #tpu.memory_space<smem>>) -> (i32, i32, i32) {
    %c0_i32 = arith.constant 0 : i32
    %c0_i32_0 = arith.constant 0 : i32
    %c0_i32_1 = arith.constant 0 : i32
    %c0_i32_2 = arith.constant 0 : i32
    return %c0_i32, %c0_i32_0, %c0_i32_1 : i32, i32, i32
  }
  func.func @transform_6(%arg0: i32, %arg1: i32, %arg2: memref<3x2xi32, #tpu.memory_space<smem>>, %arg3: memref<3xi32, #tpu.memory_space<smem>>) -> (i32, i32, i32) {
    %c0_i32 = arith.constant 0 : i32
    %c0_i32_0 = arith.constant 0 : i32
    %c0_i32_1 = arith.constant 0 : i32
    %c0_i32_2 = arith.constant 0 : i32
    return %c0_i32, %c0_i32_0, %c0_i32_1 : i32, i32, i32
  }
  func.func @transform_7(%arg0: i32, %arg1: i32, %arg2: memref<3x2xi32, #tpu.memory_space<smem>>, %arg3: memref<3xi32, #tpu.memory_space<smem>>) -> (i32, i32) {
    %c0_i32 = arith.constant 0 : i32
    %c0_i32_0 = arith.constant 0 : i32
    %c0_i32_1 = arith.constant 0 : i32
    return %c0_i32, %c0_i32_0 : i32, i32
  }
  func.func @transform_8(%arg0: i32, %arg1: i32, %arg2: memref<3x2xi32, #tpu.memory_space<smem>>, %arg3: memref<3xi32, #tpu.memory_space<smem>>) -> (i32, i32) {
    %c0_i32 = arith.constant 0 : i32
    %c0_i32_0 = arith.constant 0 : i32
    return %arg0, %c0_i32 : i32, i32
  }
}

</mosaic_0001>

<bundles_post_ra>
// kernel: _lambda_.1
= control target key start
LH: loop header
LB: loop body
LE: loop exit
PB: predicated region body
PF: predicated region fallthrough
CT: control target
= control target key end

     0   :  { %s3313_s0 = inlined_call_operand.vmem [shape: s32[3,2], index: 0, kind: input, shape index: {}]   ;;  %s3314_s2 = inlined_call_operand.vmem [shape: s32[1,384], index: 2, kind: input, shape index: {}]   ;;  %s3315_s3 = inlined_call_operand.vmem [shape: bf16[384,128], index: 3, kind: input, shape index: {}]   ;;  %s3316_s4 = inlined_call_operand.vmem [shape: bf16[384,8], index: 4, kind: input, shape index: {}]   ;;  %s3317_s5 = inlined_call_operand.vmem [shape: bf16[8,128], index: 5, kind: input, shape index: {}]   ;;  %s3318_s6 = inlined_call_operand.vmem [shape: bf16[128,256], index: 6, kind: input, shape index: {}]   ;;  %s3319_s7 = inlined_call_operand.vmem [shape: bf16[3,256,256], index: 7, kind: input, shape index: {}]   ;;  %s3320_s8 = inlined_call_operand.vmem [shape: f32[3,1,256], index: 8, kind: input, shape index: {}]   ;;  %s3321_s9 = inlined_call_operand.vmem [shape: bf16[256,128], index: 9, kind: input, shape index: {}]   ;;  %s3322_s10 = inlined_call_operand.vmem [shape: f32[24,128], index: 10, kind: output, shape index: {}]   ;;  %s3323_s1 = inlined_call_operand.vmem [shape: s32[3], index: 1, kind: input, shape index: {}]  }
   0x1   :  { %3324 = sst [smem:[#allocation7_spill]] %s3322_s10  ;;  %s15_s15 = sshll.u32 %s3313_s0, 4  ;;  %s16_s15 = int_to_ptr.vmem [resolvable:$true] %s15_s15 }
   0x2   :  { %s19_s18 = sshll.u32 %s3323_s1, 4  ;;  %s2652_s19 = scalar_lea.vmem %s16_s15, 64  ;;  %s20_s18 = int_to_ptr.vmem [resolvable:$true] %s19_s18 }
   0x3   :  { %p2653_p0 = scmp.ne.s32.totalorder %s16_s15, %s2652_s19  ;;  %p2657_p1 = scmp.lt.s32.totalorder %s16_s15, %s16_s15 }
   0x4   :  { %p2658_p2 = scmp.lt.s32.totalorder %s2652_s19, %s2652_s19 }
   0x6   :  { %p2659_p3 = por %p2658_p2, %p2657_p1 }
   0x8   :  { %p2660_p4 = pnand %p2659_p3, %p2653_p0 }
   0xa   :  { %2663 = shalt.err (!%p2660_p4)  }
   0xb   :  { %s2718_s20 = smov [#allocation4]   ;;  %s2664_s21 = scalar_lea.vmem %s20_s18, 16 }
   0xc   :  { %18 = dma.vmem_to_smem %s16_s15, 64, %s2718_s20, [#allocation3] }
   0xd   :  { %p2665_p5 = scmp.ne.s32.totalorder %s20_s18, %s2664_s21  ;;  %p2669_p6 = scmp.lt.s32.totalorder %s20_s18, %s20_s18 }
   0xe   :  { %p2670_p7 = scmp.lt.s32.totalorder %s2664_s21, %s2664_s21 }
  0x10   :  { %p2671_p8 = por %p2670_p7, %p2669_p6 }
  0x12   :  { %p2672_p9 = pnand %p2671_p8, %p2665_p5 }
  0x14   :  { %2675 = shalt.err (!%p2672_p9)  }
  0x15   :  { %s2719_s0 = smov [#allocation5]  }
  0x16   :  { %22 = dma.vmem_to_smem %s20_s18, 16, %s2719_s0, [#allocation3] }
  0x17   :  { %2696 = dma.done.wait [#allocation3], 80 }
  0x18   :  { %2697 = vsyncadd [#allocation3], 4294967216 }
  0x19   :  { %24 = sfence }
  0x1a   :  { %s2786_s1 = smov 0   ;;  %s2788_s22 = smov 0  }
  0x1b   :  { %s2790_s23 = smov 0   ;;  %s2792_s24 = smov 0  }
  0x1c   :  { %s2794_s25 = smov 0  }
  0x1d LB: > { %s39_s26 = sadd.s32 1, %s2708_s23  ;;  %s42_s27 = sadd.s32 1, %s2712_s24  ;;  %s2716_s25 = sphi %s2794_s25, %s30_s25   ;;  %s2712_s24 = sphi %s2792_s24, %s3329_s24   ;;  %s2708_s23 = sphi %s2790_s23, %s3328_s23   ;;  %s2704_s22 = sphi %s2788_s22, %s3327_s22   ;;  %s2700_s1 = sphi %s2786_s1, %s3326_s1  }
  0x1e   : > { %p40_p10 = scmp.ge.s32.totalorder %s39_s26, 2  ;;  %p2037_p11 = scmp.ge.s32.totalorder %s2716_s25, 1 }
  0x1f   : > { %p402_p12 = scmp.lt.s32.totalorder %s2716_s25, 7 }
  0x20   : > { %s3331_s26 = smov (%p40_p10, %s39_s26), 0  ;;  %s3333_s27 = smov (!%p40_p10, %s42_s27), %s2712_s24 }
  0x21   : > { %p403_p13 = pnand %p2037_p11, %p402_p12  ;;  %p44_p0 = scmp.ge.s32.totalorder %s3333_s27, 3 }
  0x22   : > { %s467_s28 = sshra.s32 (!%p403_p13), %s2700_s1, 7  ;;  %s472_s29 = sand.u32 (!%p403_p13), 127, %s2700_s1 }
  0x23   : > { %s3335_s27 = smov (%p44_p0, %s3333_s27), 0  ;;  %406 = sbr.rel (%p403_p13) target bundleno = 1669 (0x685), region = 52 }
  0x24   : > { %s469_s30 = sadd.s32 (!%p403_p13), %s2704_s22, %s467_s28  ;;  %p530_p1 = scmp.lt.s32.totalorder (!%p403_p13), %s2704_s22, 2 }
  0x25   : > { %s2038_s11 = sshll.u32 (!%p403_p13), %s469_s30, 7  ;;  %s3325_s10 = sld [smem:[#allocation7_spill]] (!%p403_p13) }
  0x26   : > { %s473_s12 = sadd.s32 (!%p403_p13), %s2038_s11, %s472_s29  ;;  %p2046_p5 = scmp.ne.s32.totalorder (!%p403_p13), %s2700_s1, 0 }
  0x27   : > { %s474_s13 = sld [smem:[#allocation4 + %s473_s12]] (!%p403_p13) }
  0x28   : > { %s493_s14 = sld [smem:[#allocation4 + %s473_s12]] }
  0x29   : > { %s515_s15 = sld [smem:[#allocation4 + %s473_s12]] }
  0x2a   : > { %s531_s16 = scalar_select %p530_p1, %s2704_s22, 2 }
  0x2c   : > { %s2045_s17 = sshll.u32 %s531_s16, 3 }
  0x2d   : > { %p475_p2 = scmp.lt.s32.totalorder %s474_s13, 2  ;;  %s2828_s20 = scalar_lea.vmem %s3325_s10, %s2045_s17 }
  0x2e   : > { %s2040_s21 = sshll.u32 %s493_s14, 4 }
  0x2f   : > { %s3337_s13 = smov (!%p475_p2, %s474_s13), 2  ;;  %p495_p3 = scmp.lt.s32.totalorder %s2040_s21, 47 }
  0x30   : > { %s2043_s0 = sshll.u32 %s515_s15, 4  ;;  %s477_s30 = scalar_lea.vmem %s3314_s2, %s3337_s13 }
  0x31   : > { %p517_p4 = scmp.lt.s32.totalorder %s2043_s0, 47  ;;  %s3339_s21 = smov (!%p495_p3, %s2040_s21), 47 }
  0x32   : > { %s2041_s11 = sshll.u32 %s3339_s21, 2  ;;  %538 = sbr.rel (%p2046_p5) target bundleno = 57 (0x39), region = 56 }
  0x33   : > { %s3341_s0 = smov (!%p517_p4, %s2043_s0), 47  ;;  %s2839_s18 = scalar_lea.vmem %s3315_s3, %s2041_s11 }
  0x34   : > { %s2044_s17 = sshll.u32 %s3341_s0, 2 }
  0x35   : > { %s520_s10 = scalar_lea.vmem %s3316_s4, %s2044_s17 }
  0x37   : > { %v2720_v0 = vmov 0.0  }
  0x38   : > { %539 = vst [vmem:[#allocation2] sm:$0xff] %v2720_v0 }
  0x39 PF: > { %s540_s15 = sld [smem:[#allocation5 + %s2704_s22]] }
  0x3f   : > { %p2047_p6 = scmp.ge.s32.totalorder %s2700_s1, %s540_s15 }
  0x41   : > { %544 = sbr.rel (%p2047_p6) target bundleno = 530 (0x212), region = 60 }
  0x46   : > { %v561_v1 = vld [vmem:[%s3317_s5] sm:$0xf]  ;;  %vm627_vm0 = vcmask 1043456   ;;  %vm602_vm1 = vcmask 64512   ;;  %v2437_v4 = vld [vmem:[%s520_s10 + $0x8] sm:$0xff]   ;;  %v2438_v5 = vld [vmem:[%s520_s10 + $0x10] sm:$0xff]   ;;  %v780_v55 = vlaneseq }
  0x47   : > { %v2436_v2 = vld [vmem:[%s520_s10] sm:$0xff]   ;;  %2388 = vmatprep.subr.msk.bf16.mxu0 %vm627_vm0, %v561_v1  ;;  %v629_v3 = vsel %vm627_vm0, %v561_v1, 0  ;;  %v2439_v6 = vld [vmem:[%s520_s10 + $0x18] sm:$0xff]   ;;  %v2441_v8 = vld [vmem:[%s520_s10 + $0x28] sm:$0xff]   ;;  %v2721_v11 = vmov 0.0   ;;  %vm2722_vm2 = vmmov 0  }
  0x48   : > { %2351 = vmatpush3.bf16.msra.mxu0 %v629_v3  ;;  %2352 = vmatprep.mubr.msk.bf16.mxu0 %vm602_vm1, %v2436_v2  ;;  %v2440_v7 = vld [vmem:[%s520_s10 + $0x20] sm:$0xff]   ;;  %v2442_v9 = vld [vmem:[%s520_s10 + $0x30] sm:$0xff]   ;;  %v2443_v10 = vld [vmem:[%s520_s10 + $0x38] sm:$0xff]   ;;  %s2064_s10 = sshll.u32 %s2704_s22, 3  ;;  %v781_v62 = vshrl.u32 %v780_v55, 7 }
  0x49   : > { %2368 = vmatprep.subr.bf16.mxu1 %v2721_v11  ;;  %2384 = vmatprep.mubr.msk.bf16.mxu1 %vm2722_vm2, %v2721_v11  ;;  %v2309_v24 = vld [vmem:[%s2839_s18 + $0x38] sm:$0xff]   ;;  %v2308_v29 = vld [vmem:[%s2839_s18 + $0x30] sm:$0xff]   ;;  %v2307_v35 = vld [vmem:[%s2839_s18 + $0x28] sm:$0xff]   ;;  %v778_v3 = vstv %s2064_s10 }
  0x4a   : > { %v2301_v26 = vunpack.c.l.bf16 %v2309_v24  ;;  %v2302_v27 = vunpack.c.h.bf16 %v2309_v24  ;;  %v2298_v30 = vunpack.c.h.bf16 %v2308_v29  ;;  %v2297_v33 = vunpack.c.l.bf16 %v2308_v29  ;;  %v2306_v42 = vld [vmem:[%s2839_s18 + $0x20] sm:$0xff]   ;;  %v2305_v48 = vld [vmem:[%s2839_s18 + $0x18] sm:$0xff]   ;;  %v2304_v54 = vld [vmem:[%s2839_s18 + $0x10] sm:$0xff]  }
  0x4b   : > { %2353 = vmatmul.mubr.msk.bf16.vlgmr.msra.gmra.mxu0 %vm602_vm1, %v2437_v4  ;;  %v2294_v37 = vunpack.c.h.bf16 %v2307_v35  ;;  %v2293_v40 = vunpack.c.l.bf16 %v2307_v35  ;;  %v2290_v44 = vunpack.c.h.bf16 %v2306_v42  ;;  %v2289_v47 = vunpack.c.l.bf16 %v2306_v42  ;;  %v2303_v61 = vld [vmem:[%s2839_s18 + $0x8] sm:$0xff]   ;;  %v776_v2 = vld [vmem:[%s477_s30] sm:$0x1] }
  0x4c   : > { %2356 = vmatprep.mubr.msk.bf16.mxu0 %vm602_vm1, %v2438_v5  ;;  %v2286_v49 = vunpack.c.h.bf16 %v2305_v48  ;;  %v2285_v52 = vunpack.c.l.bf16 %v2305_v48  ;;  %v2282_v57 = vunpack.c.h.bf16 %v2304_v54  ;;  %v2281_v60 = vunpack.c.l.bf16 %v2304_v54 }
  0x4d   : > { %v2278_v63 = vunpack.c.h.bf16 %v2303_v61  ;;  %v2277_v4 = vunpack.c.l.bf16 %v2303_v61 }
  0x53   : > { %2357 = vmatmul.mubr.msk.bf16.gmra.mxu0 %vm602_vm1, %v2439_v6  ;;  %v2272_v6 = vld [vmem:[%s2839_s18] sm:$0xff]  }
  0x54   : > { %2360 = vmatprep.mubr.msk.bf16.mxu0 %vm602_vm1, %v2440_v7  ;;  %v779_v7 = vsub.s32 %v776_v2, %v778_v3 }
  0x5b   : > { %2361 = vmatmul.mubr.msk.bf16.gmra.mxu0 %vm602_vm1, %v2441_v8  ;;  %v784_v8 = vsub.s32 0, %v781_v62 }
  0x5c   : > { %2364 = vmatprep.mubr.msk.bf16.mxu0 %vm602_vm1, %v2442_v9 }
  0x63   : > { %2365 = vmatmul.mubr.msk.bf16.gmra.mxu0 %vm602_vm1, %v2443_v10  ;;  %v2274_v10 = vunpack.c.h.bf16 %v2272_v6 }
 0x10b   : > { %v2860_v12 = vpop.f32.mrf.mxu0 }
 0x10d   : > { %v2862_v13 = vpop.f32.mrf.mxu0 }
 0x10f   : > { %v2864_v14 = vpop.f32.mrf.mxu0 }
 0x110   : > { %v763_v9 = vmul.f32 %v2864_v14, %v2278_v63  ;;  %v2723_v14 = vmov 1.0|1.0  }
 0x111   : > { %v2866_v15 = vpop.f32.mrf.mxu0 }
 0x113   : > { %v2358_v16 = vpop.f32.mrf.mxu0 }
 0x114   : > { %v766_v59 = vmul.f32 %v2358_v16, %v2285_v52 }
 0x115   : > { %v681_v17 = vpop.f32.mrf.mxu0 }
 0x116   : > { %v764_v5 = vmul.f32 %v2281_v60, %v681_v17  ;;  %v761_v17 = vmul.f32 %v2274_v10, %v2866_v15 }
 0x117   : > { %v2359_v18 = vpop.f32.mrf.mxu0 }
 0x118   : > { %v767_v56 = vmul.f32 %v2359_v18, %v2286_v49  ;;  %v762_v18 = vmul.f32 %v2860_v12, %v2277_v4  ;;  %v790_v12 = vld [vmem:[#allocation2] sm:$0xff] }
 0x119   : > { %v684_v19 = vpop.f32.mrf.mxu0 }
 0x11a   : > { %v794_v0 = vpack.c.bf16 %v767_v56, %v766_v59  ;;  %v765_v1 = vmul.f32 %v2282_v57, %v684_v19  ;;  %v2273_v19 = vunpack.c.l.bf16 %v2272_v6 }
 0x11b   : > { %v2362_v20 = vpop.f32.mrf.mxu0 }
 0x11c   : > { %v770_v46 = vmul.f32 %v2362_v20, %v2293_v40  ;;  %v793_v16 = vpack.c.bf16 %v765_v1, %v764_v5  ;;  %v785_v20 = vrot.slane %v779_v7, %v784_v8 }
 0x11d   : > { %v697_v21 = vpop.f32.mrf.mxu0 }
 0x11e   : > { %v768_v53 = vmul.f32 %v2289_v47, %v697_v21  ;;  %v792_v21 = vpack.c.bf16 %v763_v9, %v762_v18  ;;  %vm786_vm3 = vcmp.eq.s32.totalorder %v781_v62, %v785_v20 }
 0x11f   : > { %v2363_v22 = vpop.f32.mrf.mxu0  ;;  %vm2066_vm4 = vmpackc.low %vm786_vm3, %vm786_vm3 }
 0x120   : > { %v771_v43 = vmul.f32 %v2363_v22, %v2294_v37  ;;  %v760_v22 = vmul.f32 %v2273_v19, %v2862_v13 }
 0x121   : > { %v700_v23 = vpop.f32.mrf.mxu0 }
 0x122   : > { %v796_v50 = vpack.c.bf16 %v771_v43, %v770_v46  ;;  %v769_v51 = vmul.f32 %v2290_v44, %v700_v23  ;;  %v791_v23 = vpack.c.bf16 %v761_v17, %v760_v22 }
 0x123   : > { %v2366_v25 = vpop.f32.mrf.mxu0 }
 0x124   : > { %v774_v32 = vmul.f32 %v2366_v25, %v2301_v26  ;;  %v795_v58 = vpack.c.bf16 %v769_v51, %v768_v53 }
 0x125   : > { %v713_v28 = vpop.f32.mrf.mxu0 }
 0x126   : > { %v772_v41 = vmul.f32 %v2297_v33, %v713_v28 }
 0x127   : > { %v2367_v31 = vpop.f32.mrf.mxu0 }
 0x128   : > { %v775_v34 = vmul.f32 %v2367_v31, %v2302_v27 }
 0x129   : > { %v716_v36 = vpop.f32.mrf.mxu0 }
 0x12a   : > { %v773_v38 = vmul.f32 %v2298_v30, %v716_v36  ;;  %v798_v39 = vpack.c.bf16 %v775_v34, %v774_v32 }
 0x12c   : > { %2369 = vmatpush3.bf16.msra.mxu1 %v798_v39  ;;  %v797_v45 = vpack.c.bf16 %v773_v38, %v772_v41 }
 0x12d   : > { %2370 = vmatprep.subr.bf16.mxu1 %v2721_v11 }
 0x130   : > { %2371 = vmatpush3.bf16.msra.mxu1 %v797_v45 }
 0x131   : > { %2372 = vmatprep.subr.bf16.mxu1 %v2721_v11 }
 0x134   : > { %2373 = vmatpush3.bf16.msra.mxu1 %v796_v50 }
 0x135   : > { %2374 = vmatprep.subr.bf16.mxu1 %v2721_v11 }
 0x138   : > { %2375 = vmatpush3.bf16.msra.mxu1 %v795_v58 }
 0x139   : > { %2376 = vmatprep.subr.bf16.mxu1 %v2721_v11 }
 0x13c   : > { %2377 = vmatpush3.bf16.msra.mxu1 %v794_v0 }
 0x13d   : > { %2378 = vmatprep.subr.bf16.mxu1 %v2721_v11 }
 0x140   : > { %2379 = vmatpush3.bf16.msra.mxu1 %v793_v16 }
 0x141   : > { %2380 = vmatprep.subr.bf16.mxu1 %v2721_v11 }
 0x144   : > { %2381 = vmatpush3.bf16.msra.mxu1 %v792_v21 }
 0x145   : > { %2382 = vmatprep.subr.bf16.mxu1 %v2721_v11 }
 0x148   : > { %2383 = vmatpush3.bf16.msra.mxu1 %v791_v23 }
 0x14b   : > { %2385 = vmatmul.mubr.msk.bf16.vlgmr.msra.gmra.mxu1 %vm2066_vm4, %v2723_v14 }
 0x20b   : > { %v833_v24 = vpop.f32.mrf.mxu1 }
 0x20c   : > { %v839_v25 = vadd.f32 %v833_v24, %v790_v12 }
 0x20d   : > { %v2386_v26 = vpop.f32.mrf.mxu1 }
 0x20e   : > { %840 = vst [vmem:[#allocation2] sm:$0xff] %v839_v25 }
 0x20f   : > { %v836_v27 = vpop.f32.mrf.mxu1 }
 0x211   : > { %v2387_v28 = vpop.f32.mrf.mxu1 }
 0x212 PF: > { %p2068_p7 = scmp.ne.s32.totalorder %s2700_s1, 1 }
 0x214   : > { %844 = sbr.rel (%p2068_p7) target bundleno = 1669 (0x685), region = 64 }
 0x219   : > { %v2444_v11 = vld [vmem:[%s3318_s6 + $0x74] ss:$8 sps:$4 sm:$0xff]   ;;  %v2446_v13 = vld [vmem:[%s3318_s6 + $0x70] ss:$8 sps:$4 sm:$0xff]   ;;  %v2724_v15 = vmov 0   ;;  %v845_v52 = vld [vmem:[#allocation2] sm:$0xff] }
 0x21a   : > { %975 = vmatprep.mubr.bf16.mxu0 %v2724_v15  ;;  %943 = vmatprep.subr.bf16.mxu0 %v2444_v11  ;;  %v2447_v29 = vld [vmem:[%s3318_s6 + $0x64] ss:$8 sps:$4 sm:$0xff]   ;;  %v2449_v30 = vld [vmem:[%s3318_s6 + $0x60] ss:$8 sps:$4 sm:$0xff]   ;;  %v2450_v31 = vld [vmem:[%s3318_s6 + $0x54] ss:$8 sps:$4 sm:$0xff]   ;;  %v846_v55 = vpack.c.bf16 %v845_v52, %v845_v52 }
 0x21b   : > { %944 = vmatpush1.bf16.msra.mxu0 %v2446_v13  ;;  %v2452_v32 = vld [vmem:[%s3318_s6 + $0x50] ss:$8 sps:$4 sm:$0xff]   ;;  %v2453_v33 = vld [vmem:[%s3318_s6 + $0x44] ss:$8 sps:$4 sm:$0xff]   ;;  %v2455_v34 = vld [vmem:[%s3318_s6 + $0x40] ss:$8 sps:$4 sm:$0xff]  }
 0x21c   : > { %945 = vmatprep.subr.bf16.mxu0 %v2447_v29  ;;  %v2456_v35 = vld [vmem:[%s3318_s6 + $0x34] ss:$8 sps:$4 sm:$0xff]   ;;  %v2470_v37 = vld [vmem:[%s3319_s7 + $0x70] ss:$8 sps:$4 sm:$0xff]   ;;  %v2471_v38 = vld [vmem:[%s3319_s7 + $0x64] ss:$8 sps:$4 sm:$0xff]  }
 0x21d   : > { %v2468_v36 = vld [vmem:[%s3319_s7 + $0x74] ss:$8 sps:$4 sm:$0xff]   ;;  %v2458_v39 = vld [vmem:[%s3318_s6 + $0x30] ss:$8 sps:$4 sm:$0xff]   ;;  %v2473_v40 = vld [vmem:[%s3319_s7 + $0x60] ss:$8 sps:$4 sm:$0xff]  }
 0x21e   : > { %1190 = vmatprep.subr.bf16.mxu1 %v2468_v36  ;;  %v2474_v41 = vld [vmem:[%s3319_s7 + $0x54] ss:$8 sps:$4 sm:$0xff]   ;;  %v2459_v42 = vld [vmem:[%s3318_s6 + $0x24] ss:$8 sps:$4 sm:$0xff]   ;;  %v2461_v43 = vld [vmem:[%s3318_s6 + $0x20] ss:$8 sps:$4 sm:$0xff]  }
 0x21f   : > { %946 = vmatpush1.bf16.msra.mxu0 %v2449_v30  ;;  %1191 = vmatpush1.bf16.msra.mxu1 %v2470_v37  ;;  %v2476_v44 = vld [vmem:[%s3319_s7 + $0x50] ss:$8 sps:$4 sm:$0xff]   ;;  %v2477_v45 = vld [vmem:[%s3319_s7 + $0x44] ss:$8 sps:$4 sm:$0xff]   ;;  %v2462_v46 = vld [vmem:[%s3318_s6 + $0x14] ss:$8 sps:$4 sm:$0xff]  }
 0x220   : > { %947 = vmatprep.subr.bf16.mxu0 %v2450_v31  ;;  %1192 = vmatprep.subr.bf16.mxu1 %v2471_v38  ;;  %v2464_v47 = vld [vmem:[%s3318_s6 + $0x10] ss:$8 sps:$4 sm:$0xff]   ;;  %v2479_v48 = vld [vmem:[%s3319_s7 + $0x40] ss:$8 sps:$4 sm:$0xff]   ;;  %v2480_v49 = vld [vmem:[%s3319_s7 + $0x34] ss:$8 sps:$4 sm:$0xff]  }
 0x221   : > { %v2465_v50 = vld [vmem:[%s3318_s6 + $0x4] ss:$8 sps:$4 sm:$0xff]   ;;  %v2467_v51 = vld [vmem:[%s3318_s6] ss:$8 sps:$4 sm:$0xff]   ;;  %v2482_v53 = vld [vmem:[%s3319_s7 + $0x30] ss:$8 sps:$4 sm:$0xff]  }
 0x222   : > { %v2483_v54 = vld [vmem:[%s3319_s7 + $0x24] ss:$8 sps:$4 sm:$0xff]   ;;  %v2485_v56 = vld [vmem:[%s3319_s7 + $0x20] ss:$8 sps:$4 sm:$0xff]   ;;  %v2486_v57 = vld [vmem:[%s3319_s7 + $0x14] ss:$8 sps:$4 sm:$0xff]  }
 0x223   : > { %948 = vmatpush1.bf16.msra.mxu0 %v2452_v32  ;;  %1193 = vmatpush1.bf16.msra.mxu1 %v2473_v40  ;;  %v2488_v58 = vld [vmem:[%s3319_s7 + $0x10] ss:$8 sps:$4 sm:$0xff]   ;;  %v2489_v59 = vld [vmem:[%s3319_s7 + $0x4] ss:$8 sps:$4 sm:$0xff]   ;;  %v2491_v60 = vld [vmem:[%s3319_s7] ss:$8 sps:$4 sm:$0xff]  }
 0x224   : > { %949 = vmatprep.subr.bf16.mxu0 %v2453_v33  ;;  %1194 = vmatprep.subr.bf16.mxu1 %v2474_v41  ;;  %v2492_v61 = vld [vmem:[%s3319_s7 + $0xf4] ss:$8 sps:$4 sm:$0xff]   ;;  %v2494_v62 = vld [vmem:[%s3319_s7 + $0xf0] ss:$8 sps:$4 sm:$0xff]   ;;  %v2495_v63 = vld [vmem:[%s3319_s7 + $0xe4] ss:$8 sps:$4 sm:$0xff]  }
 0x225   : > { %v2497_v0 = vld [vmem:[%s3319_s7 + $0xe0] ss:$8 sps:$4 sm:$0xff]   ;;  %v2498_v1 = vld [vmem:[%s3319_s7 + $0xd4] ss:$8 sps:$4 sm:$0xff]   ;;  %v2500_v2 = vld [vmem:[%s3319_s7 + $0xd0] ss:$8 sps:$4 sm:$0xff]  }
 0x226   : > { %v2501_v3 = vld [vmem:[%s3319_s7 + $0xc4] ss:$8 sps:$4 sm:$0xff]   ;;  %v2503_v4 = vld [vmem:[%s3319_s7 + $0xc0] ss:$8 sps:$4 sm:$0xff]   ;;  %v2504_v5 = vld [vmem:[%s3319_s7 + $0xb4] ss:$8 sps:$4 sm:$0xff]  }
 0x227   : > { %950 = vmatpush1.bf16.msra.mxu0 %v2455_v34  ;;  %1195 = vmatpush1.bf16.msra.mxu1 %v2476_v44  ;;  %v2506_v6 = vld [vmem:[%s3319_s7 + $0xb0] ss:$8 sps:$4 sm:$0xff]   ;;  %v2507_v7 = vld [vmem:[%s3319_s7 + $0xa4] ss:$8 sps:$4 sm:$0xff]   ;;  %v2509_v8 = vld [vmem:[%s3319_s7 + $0xa0] ss:$8 sps:$4 sm:$0xff]  }
 0x228   : > { %951 = vmatprep.subr.bf16.mxu0 %v2456_v35  ;;  %1196 = vmatprep.subr.bf16.mxu1 %v2477_v45  ;;  %v2510_v9 = vld [vmem:[%s3319_s7 + $0x94] ss:$8 sps:$4 sm:$0xff]   ;;  %v2512_v10 = vld [vmem:[%s3319_s7 + $0x90] ss:$8 sps:$4 sm:$0xff]   ;;  %v2513_v16 = vld [vmem:[%s3319_s7 + $0x84] ss:$8 sps:$4 sm:$0xff]  }
 0x229   : > { %v2515_v18 = vld [vmem:[%s3319_s7 + $0x80] ss:$8 sps:$4 sm:$0xff]   ;;  %v2516_v19 = vld [vmem:[%s3319_s7 + $0x170] ss:$8 sps:$4 sm:$0xff]   ;;  %v2518_v20 = vld [vmem:[%s3319_s7 + $0x174] ss:$8 sps:$4 sm:$0xff]  }
 0x22a   : > { %v2521_v21 = vld [vmem:[%s3319_s7 + $0x164] ss:$8 sps:$4 sm:$0xff]   ;;  %v2519_v17 = vld [vmem:[%s3319_s7 + $0x160] ss:$8 sps:$4 sm:$0xff]   ;;  %v2524_v22 = vld [vmem:[%s3319_s7 + $0x154] ss:$8 sps:$4 sm:$0xff]  }
 0x22b   : > { %952 = vmatpush1.bf16.msra.mxu0 %v2458_v39  ;;  %1197 = vmatpush1.bf16.msra.mxu1 %v2479_v48  ;;  %v2522_v23 = vld [vmem:[%s3319_s7 + $0x150] ss:$8 sps:$4 sm:$0xff]   ;;  %v2527_v14 = vld [vmem:[%s3319_s7 + $0x144] ss:$8 sps:$4 sm:$0xff]   ;;  %v2525_v12 = vld [vmem:[%s3319_s7 + $0x140] ss:$8 sps:$4 sm:$0xff]  }
 0x22c   : > { %953 = vmatprep.subr.bf16.mxu0 %v2459_v42  ;;  %1198 = vmatprep.subr.bf16.mxu1 %v2480_v49  ;;  %v2530_v24 = vld [vmem:[%s3319_s7 + $0x134] ss:$8 sps:$4 sm:$0xff]   ;;  %v2528_v25 = vld [vmem:[%s3319_s7 + $0x130] ss:$8 sps:$4 sm:$0xff]   ;;  %v2533_v26 = vld [vmem:[%s3319_s7 + $0x124] ss:$8 sps:$4 sm:$0xff]  }
 0x22d   : > { %v2531_v27 = vld [vmem:[%s3319_s7 + $0x120] ss:$8 sps:$4 sm:$0xff]   ;;  %v2536_v31 = vld [vmem:[%s3319_s7 + $0x114] ss:$8 sps:$4 sm:$0xff]   ;;  %v2534_v32 = vld [vmem:[%s3319_s7 + $0x110] ss:$8 sps:$4 sm:$0xff]  }
 0x22e   : > { %v2539_v33 = vld [vmem:[%s3319_s7 + $0x104] ss:$8 sps:$4 sm:$0xff]   ;;  %v2537_v34 = vld [vmem:[%s3319_s7 + $0x100] ss:$8 sps:$4 sm:$0xff]   ;;  %v2542_v35 = vld [vmem:[%s3319_s7 + $0x1f4] ss:$8 sps:$4 sm:$0xff]  }
 0x22f   : > { %954 = vmatpush1.bf16.msra.mxu0 %v2461_v43  ;;  %1199 = vmatpush1.bf16.msra.mxu1 %v2482_v53  ;;  %v2540_v36 = vld [vmem:[%s3319_s7 + $0x1f0] ss:$8 sps:$4 sm:$0xff]   ;;  %v2545_v37 = vld [vmem:[%s3319_s7 + $0x1e4] ss:$8 sps:$4 sm:$0xff]   ;;  %v2543_v38 = vld [vmem:[%s3319_s7 + $0x1e0] ss:$8 sps:$4 sm:$0xff]  }
 0x230   : > { %955 = vmatprep.subr.bf16.mxu0 %v2462_v46  ;;  %1200 = vmatprep.subr.bf16.mxu1 %v2483_v54  ;;  %v2548_v39 = vld [vmem:[%s3319_s7 + $0x1d4] ss:$8 sps:$4 sm:$0xff]   ;;  %v2546_v40 = vld [vmem:[%s3319_s7 + $0x1d0] ss:$8 sps:$4 sm:$0xff]   ;;  %v2551_v41 = vld [vmem:[%s3319_s7 + $0x1c4] ss:$8 sps:$4 sm:$0xff]  }
 0x231   : > { %v2549_v42 = vld [vmem:[%s3319_s7 + $0x1c0] ss:$8 sps:$4 sm:$0xff]   ;;  %v2554_v43 = vld [vmem:[%s3319_s7 + $0x1b4] ss:$8 sps:$4 sm:$0xff]   ;;  %v2552_v44 = vld [vmem:[%s3319_s7 + $0x1b0] ss:$8 sps:$4 sm:$0xff]  }
 0x232   : > { %v2557_v45 = vld [vmem:[%s3319_s7 + $0x1a4] ss:$8 sps:$4 sm:$0xff]   ;;  %v2555_v46 = vld [vmem:[%s3319_s7 + $0x1a0] ss:$8 sps:$4 sm:$0xff]   ;;  %v2558_v48 = vld [vmem:[%s3319_s7 + $0x190] ss:$8 sps:$4 sm:$0xff]  }
 0x233   : > { %956 = vmatpush1.bf16.msra.mxu0 %v2464_v47  ;;  %1201 = vmatpush1.bf16.msra.mxu1 %v2485_v56  ;;  %v2560_v47 = vld [vmem:[%s3319_s7 + $0x194] ss:$8 sps:$4 sm:$0xff]   ;;  %v2563_v49 = vld [vmem:[%s3319_s7 + $0x184] ss:$8 sps:$4 sm:$0xff]   ;;  %v2567_v54 = vld [vmem:[%s3319_s7 + $0x260] ss:$8 sps:$4 sm:$0xff]  }
 0x234   : > { %957 = vmatprep.subr.bf16.mxu0 %v2465_v50  ;;  %1202 = vmatprep.subr.bf16.mxu1 %v2486_v57  ;;  %v2561_v50 = vld [vmem:[%s3319_s7 + $0x180] ss:$8 sps:$4 sm:$0xff]   ;;  %v2566_v52 = vld [vmem:[%s3319_s7 + $0x274] ss:$8 sps:$4 sm:$0xff]   ;;  %v2569_v53 = vld [vmem:[%s3319_s7 + $0x264] ss:$8 sps:$4 sm:$0xff]  }
 0x235   : > { %v2570_v56 = vld [vmem:[%s3319_s7 + $0x250] ss:$8 sps:$4 sm:$0xff]   ;;  %v2575_v57 = vld [vmem:[%s3319_s7 + $0x244] ss:$8 sps:$4 sm:$0xff]  }
 0x237   : > { %958 = vmatpush1.bf16.msra.mxu0 %v2467_v51  ;;  %1203 = vmatpush1.bf16.msra.mxu1 %v2488_v58  ;;  %v2564_v51 = vld [vmem:[%s3319_s7 + $0x270] ss:$8 sps:$4 sm:$0xff]   ;;  %v2573_v58 = vld [vmem:[%s3319_s7 + $0x240] ss:$8 sps:$4 sm:$0xff]  }
 0x238   : > { %1204 = vmatprep.subr.bf16.mxu1 %v2489_v59  ;;  %1453 = vmatprep.subr.bf16.mxu0 %v2518_v20  ;;  %v2578_v59 = vld [vmem:[%s3319_s7 + $0x234] ss:$8 sps:$4 sm:$0xff]  }
 0x23a   : > { %976 = vmatmul.mubr.bf16.vlgmr.msra.gmra.mxu0 %v846_v55  ;;  %v2572_v55 = vld [vmem:[%s3319_s7 + $0x254] ss:$8 sps:$4 sm:$0xff]  }
 0x23b   : > { %1205 = vmatpush1.bf16.msra.mxu1 %v2491_v60  ;;  %1454 = vmatpush1.bf16.msra.mxu0 %v2516_v19  ;;  %v2576_v60 = vld [vmem:[%s3319_s7 + $0x230] ss:$8 sps:$4 sm:$0xff]  }
 0x23c   : > { %1206 = vmatprep.subr.bf16.mxu1 %v2492_v61  ;;  %1455 = vmatprep.subr.bf16.mxu0 %v2521_v21  ;;  %v2581_v61 = vld [vmem:[%s3319_s7 + $0x224] ss:$8 sps:$4 sm:$0xff]  }
 0x23f   : > { %1207 = vmatpush2.bf16.msra.mxu1 %v2494_v62  ;;  %1456 = vmatpush1.bf16.msra.mxu0 %v2519_v17  ;;  %v2579_v62 = vld [vmem:[%s3319_s7 + $0x220] ss:$8 sps:$4 sm:$0xff]  }
 0x240   : > { %1208 = vmatprep.subr.bf16.mxu1 %v2495_v63  ;;  %1457 = vmatprep.subr.bf16.mxu0 %v2524_v22  ;;  %v1020_v63 = vlaneseq }
 0x243   : > { %1209 = vmatpush2.bf16.msra.mxu1 %v2497_v0  ;;  %1458 = vmatpush1.bf16.msra.mxu0 %v2522_v23  ;;  %v1021_v0 = vshrl.u32 %v1020_v63, 7 }
 0x244   : > { %1210 = vmatprep.subr.bf16.mxu1 %v2498_v1  ;;  %1459 = vmatprep.subr.bf16.mxu0 %v2527_v14 }
 0x245   : > { %v3170_v1 = vsub.s32 0, %v1021_v0 }
 0x247   : > { %1211 = vmatpush2.bf16.msra.mxu1 %v2500_v2  ;;  %1460 = vmatpush1.bf16.msra.mxu0 %v2525_v12  ;;  %v1018_v2 = vld [vmem:[%s3320_s8] sm:$0x3] }
 0x248   : > { %1212 = vmatprep.subr.bf16.mxu1 %v2501_v3  ;;  %1461 = vmatprep.subr.bf16.mxu0 %v2530_v24  ;;  %v3175_v3 = vsub.s32 1, %v1021_v0 }
 0x24b   : > { %1213 = vmatpush2.bf16.msra.mxu1 %v2503_v4  ;;  %1462 = vmatpush1.bf16.msra.mxu0 %v2528_v25  ;;  %v1023_v4 = vrot.slane %v1018_v2, %v3170_v1 }
 0x24c   : > { %1214 = vmatprep.subr.bf16.mxu1 %v2504_v5  ;;  %1463 = vmatprep.subr.bf16.mxu0 %v2533_v26  ;;  %v1027_v5 = vrot.slane %v1018_v2, %v3175_v3  ;;  %v2612_v2 = vld [vmem:[%s3321_s9 + $0x78] sm:$0xff]  }
 0x24f   : > { %1215 = vmatpush2.bf16.msra.mxu1 %v2506_v6  ;;  %1464 = vmatpush1.bf16.msra.mxu0 %v2531_v27  ;;  %v2584_v27 = vld [vmem:[%s3319_s7 + $0x214] ss:$8 sps:$4 sm:$0xff]  }
 0x250   : > { %1216 = vmatprep.subr.bf16.mxu1 %v2507_v7  ;;  %1465 = vmatprep.subr.bf16.mxu0 %v2536_v31  ;;  %v2591_v31 = vld [vmem:[%s3319_s7 + $0x2e0] ss:$8 sps:$4 sm:$0xff]  }
 0x253   : > { %1217 = vmatpush2.bf16.msra.mxu1 %v2509_v8  ;;  %1466 = vmatpush1.bf16.msra.mxu0 %v2534_v32  ;;  %v2596_v32 = vld [vmem:[%s3319_s7 + $0x2d4] ss:$8 sps:$4 sm:$0xff]  }
 0x254   : > { %1218 = vmatprep.subr.bf16.mxu1 %v2510_v9  ;;  %1467 = vmatprep.subr.bf16.mxu0 %v2539_v33  ;;  %v2594_v33 = vld [vmem:[%s3319_s7 + $0x2d0] ss:$8 sps:$4 sm:$0xff]  }
 0x257   : > { %1219 = vmatpush2.bf16.msra.mxu1 %v2512_v10  ;;  %1468 = vmatpush1.bf16.msra.mxu0 %v2537_v34  ;;  %v2599_v34 = vld [vmem:[%s3319_s7 + $0x2c4] ss:$8 sps:$4 sm:$0xff]  }
 0x258   : > { %1220 = vmatprep.subr.bf16.mxu1 %v2513_v16  ;;  %1469 = vmatprep.subr.bf16.mxu0 %v2542_v35  ;;  %v2597_v35 = vld [vmem:[%s3319_s7 + $0x2c0] ss:$8 sps:$4 sm:$0xff]  }
 0x25b   : > { %1221 = vmatpush2.bf16.msra.mxu1 %v2515_v18  ;;  %1470 = vmatpush2.bf16.msra.mxu0 %v2540_v36  ;;  %v2602_v36 = vld [vmem:[%s3319_s7 + $0x2b4] ss:$8 sps:$4 sm:$0xff]  }
 0x25c   : > { %1471 = vmatprep.subr.bf16.mxu0 %v2545_v37  ;;  %1716 = vmatprep.subr.bf16.mxu1 %v2566_v52  ;;  %v2600_v37 = vld [vmem:[%s3319_s7 + $0x2b0] ss:$8 sps:$4 sm:$0xff]  }
 0x25f   : > { %1472 = vmatpush2.bf16.msra.mxu0 %v2543_v38  ;;  %v2605_v38 = vld [vmem:[%s3319_s7 + $0x2a4] ss:$8 sps:$4 sm:$0xff]  }
 0x260   : > { %1473 = vmatprep.subr.bf16.mxu0 %v2548_v39  ;;  %v2603_v39 = vld [vmem:[%s3319_s7 + $0x2a0] ss:$8 sps:$4 sm:$0xff]  }
 0x263   : > { %1474 = vmatpush2.bf16.msra.mxu0 %v2546_v40  ;;  %v2608_v40 = vld [vmem:[%s3319_s7 + $0x294] ss:$8 sps:$4 sm:$0xff]  }
 0x264   : > { %1475 = vmatprep.subr.bf16.mxu0 %v2551_v41  ;;  %v2606_v41 = vld [vmem:[%s3319_s7 + $0x290] ss:$8 sps:$4 sm:$0xff]  }
 0x267   : > { %1476 = vmatpush2.bf16.msra.mxu0 %v2549_v42  ;;  %v2611_v42 = vld [vmem:[%s3319_s7 + $0x284] ss:$8 sps:$4 sm:$0xff]  }
 0x268   : > { %1477 = vmatprep.subr.bf16.mxu0 %v2554_v43  ;;  %v2609_v43 = vld [vmem:[%s3319_s7 + $0x280] ss:$8 sps:$4 sm:$0xff]  }
 0x26b   : > { %1478 = vmatpush2.bf16.msra.mxu0 %v2552_v44  ;;  %v2151_v44 = vld [vmem:[%s3320_s8 + $0x2] sm:$0x3] }
 0x26c   : > { %1479 = vmatprep.subr.bf16.mxu0 %v2557_v45  ;;  %v1286_v45 = vrot.slane %v2151_v44, %v3170_v1 }
 0x26f   : > { %1480 = vmatpush2.bf16.msra.mxu0 %v2555_v46  ;;  %v1290_v46 = vrot.slane %v2151_v44, %v3175_v3 }
 0x270   : > { %1481 = vmatprep.subr.bf16.mxu0 %v2560_v47 }
 0x273   : > { %1482 = vmatpush2.bf16.msra.mxu0 %v2558_v48 }
 0x274   : > { %1483 = vmatprep.subr.bf16.mxu0 %v2563_v49 }
 0x277   : > { %1484 = vmatpush2.bf16.msra.mxu0 %v2561_v50 }
 0x278   : > { %2328 = vmatprep.subr.bf16.mxu0 %v2612_v2 }
 0x2fa   : > { %v977_v28 = vpop.f32.mrf.mxu0 }
 0x2fb   : > { %v984_v15 = vpack.c.bf16 %v977_v28, %v977_v28  ;;  %v2582_v28 = vld [vmem:[%s3319_s7 + $0x210] ss:$8 sps:$4 sm:$0xff]  }
 0x2fc   : > { %v979_v11 = vpop.f32.mrf.mxu0 }
 0x2fd   : > { %v985_v13 = vpack.c.bf16 %v979_v11, %v979_v11  ;;  %v2587_v11 = vld [vmem:[%s3319_s7 + $0x204] ss:$8 sps:$4 sm:$0xff]  }
 0x2fe   : > { %v981_v29 = vpop.f32.mrf.mxu0 }
 0x2ff   : > { %1222 = vmatprep.mubr.bf16.mxu1 %v985_v13  ;;  %v2585_v13 = vld [vmem:[%s3319_s7 + $0x200] ss:$8 sps:$4 sm:$0xff]   ;;  %v2588_v29 = vld [vmem:[%s3319_s7 + $0x2f0] ss:$8 sps:$4 sm:$0xff]  }
 0x300   : > { %v982_v30 = vpop.f32.mrf.mxu0  ;;  %1223 = vmatmul.mubr.bf16.vlgmr.msra.gmra.mxu1 %v984_v15  ;;  %v2590_v15 = vld [vmem:[%s3319_s7 + $0x2f4] ss:$8 sps:$4 sm:$0xff]  }
 0x301   : > { %1717 = vmatpush1.bf16.msra.mxu1 %v2564_v51  ;;  %v2593_v30 = vld [vmem:[%s3319_s7 + $0x2e4] ss:$8 sps:$4 sm:$0xff]  }
 0x302   : > { %1718 = vmatprep.subr.bf16.mxu1 %v2569_v53 }
 0x305   : > { %1719 = vmatpush1.bf16.msra.mxu1 %v2567_v54 }
 0x306   : > { %1720 = vmatprep.subr.bf16.mxu1 %v2572_v55 }
 0x309   : > { %1721 = vmatpush1.bf16.msra.mxu1 %v2570_v56 }
 0x30a   : > { %1722 = vmatprep.subr.bf16.mxu1 %v2575_v57 }
 0x30d   : > { %1723 = vmatpush1.bf16.msra.mxu1 %v2573_v58 }
 0x30e   : > { %1724 = vmatprep.subr.bf16.mxu1 %v2578_v59 }
 0x311   : > { %1725 = vmatpush1.bf16.msra.mxu1 %v2576_v60 }
 0x312   : > { %1726 = vmatprep.subr.bf16.mxu1 %v2581_v61 }
 0x315   : > { %1727 = vmatpush1.bf16.msra.mxu1 %v2579_v62 }
 0x316   : > { %1728 = vmatprep.subr.bf16.mxu1 %v2584_v27 }
 0x319   : > { %1729 = vmatpush1.bf16.msra.mxu1 %v2582_v28 }
 0x31a   : > { %1730 = vmatprep.subr.bf16.mxu1 %v2587_v11 }
 0x31d   : > { %1731 = vmatpush1.bf16.msra.mxu1 %v2585_v13 }
 0x31e   : > { %1732 = vmatprep.subr.bf16.mxu1 %v2590_v15 }
 0x321   : > { %1733 = vmatpush2.bf16.msra.mxu1 %v2588_v29 }
 0x322   : > { %1734 = vmatprep.subr.bf16.mxu1 %v2593_v30 }
 0x325   : > { %1735 = vmatpush2.bf16.msra.mxu1 %v2591_v31 }
 0x326   : > { %1736 = vmatprep.subr.bf16.mxu1 %v2596_v32 }
 0x329   : > { %1737 = vmatpush2.bf16.msra.mxu1 %v2594_v33 }
 0x32a   : > { %1738 = vmatprep.subr.bf16.mxu1 %v2599_v34 }
 0x32d   : > { %1739 = vmatpush2.bf16.msra.mxu1 %v2597_v35 }
 0x32e   : > { %1740 = vmatprep.subr.bf16.mxu1 %v2602_v36 }
 0x331   : > { %1741 = vmatpush2.bf16.msra.mxu1 %v2600_v37 }
 0x332   : > { %1742 = vmatprep.subr.bf16.mxu1 %v2605_v38 }
 0x335   : > { %1743 = vmatpush2.bf16.msra.mxu1 %v2603_v39 }
 0x336   : > { %1744 = vmatprep.subr.bf16.mxu1 %v2608_v40 }
 0x339   : > { %1745 = vmatpush2.bf16.msra.mxu1 %v2606_v41 }
 0x33a   : > { %1746 = vmatprep.subr.bf16.mxu1 %v2611_v42 }
 0x33d   : > { %1747 = vmatpush2.bf16.msra.mxu1 %v2609_v43 }
 0x3c0   : > { %v1224_v6 = vpop.f32.mrf.mxu1 }
 0x3c1   : > { %v1225_v7 = vadd.f32 %v1224_v6, %v1023_v4  ;;  %v2613_v4 = vld [vmem:[%s3321_s9 + $0x38] sm:$0xff]   ;;  %v2615_v6 = vld [vmem:[%s3321_s9 + $0x30] sm:$0xff]  }
 0x3c2   : > { %v1226_v8 = vpop.f32.mrf.mxu1 }
 0x3c3   : > { %v2117_v9 = vmul.f32 -1.442695, %v1225_v7  ;;  %v1227_v10 = vadd.f32 %v1226_v8, %v1027_v5  ;;  %v2614_v5 = vld [vmem:[%s3321_s9 + $0x70] sm:$0xff]   ;;  %v2617_v8 = vld [vmem:[%s3321_s9 + $0x28] sm:$0xff]  }
 0x3c4   : > { %v1228_v16 = vpop.f32.mrf.mxu1 }
 0x3c5   : > { %2628 = vpow2.f32 %v2117_v9  ;;  %v2118_v18 = vmul.f32 -1.442695, %v1227_v10  ;;  %v2618_v9 = vld [vmem:[%s3321_s9 + $0x60] sm:$0xff]   ;;  %v2620_v16 = vld [vmem:[%s3321_s9 + $0x58] sm:$0xff]  }
 0x3c6   : > { %v1229_v19 = vpop.f32.mrf.mxu1 }
 0x3c7   : > { %2630 = vpow2.f32 %v2118_v18  ;;  %v2621_v18 = vld [vmem:[%s3321_s9 + $0x18] sm:$0xff]   ;;  %v2622_v19 = vld [vmem:[%s3321_s9 + $0x50] sm:$0xff]  }
 0x3d2   : > { %v2629_v20 = vpop.eup %2628 }
 0x3d3   : > { %v1237_v21 = vadd.f32 1.0, %v2629_v20  ;;  %v2623_v20 = vld [vmem:[%s3321_s9 + $0x10] sm:$0xff]  }
 0x3d4   : > { %v2631_v17 = vpop.eup %2630 }
 0x3d5   : > { %2632 = vrcp.f32 %v1237_v21  ;;  %v1238_v22 = vadd.f32 1.0, %v2631_v17  ;;  %v2624_v21 = vld [vmem:[%s3321_s9 + $0x48] sm:$0xff]  }
 0x3d6   : > { %v2625_v17 = vld [vmem:[%s3321_s9 + $0x8] sm:$0xff]  }
 0x3d7   : > { %2634 = vrcp.f32 %v1238_v22  ;;  %v2626_v22 = vld [vmem:[%s3321_s9 + $0x40] sm:$0xff]  }
 0x3e2   : > { %v2633_v23 = vpop.eup %2632 }
 0x3e3   : > { %v1243_v12 = vmul.f32 %v2633_v23, %v1225_v7  ;;  %v2616_v7 = vld [vmem:[%s3321_s9 + $0x68] sm:$0xff]   ;;  %v2627_v23 = vld [vmem:[%s3321_s9] sm:$0xff]  }
 0x3e4   : > { %v2635_v14 = vpop.eup %2634 }
 0x3e5   : > { %v1244_v24 = vmul.f32 %v2635_v14, %v1227_v10  ;;  %v1245_v26 = vpack.c.bf16 %v1243_v12, %v1243_v12  ;;  %v2619_v10 = vld [vmem:[%s3321_s9 + $0x20] sm:$0xff]  }
 0x3e6   : > { %v2218_v14 = vld [vmem:[%s3320_s8 + $0x4] sm:$0x3] }
 0x3e7   : > { %v1246_v25 = vpack.c.bf16 %v1244_v24, %v1244_v24  ;;  %v1549_v12 = vrot.slane %v2218_v14, %v3170_v1  ;;  %v1553_v24 = vrot.slane %v2218_v14, %v3175_v3 }
 0x3e9   : > { %1485 = vmatprep.mubr.bf16.mxu0 %v1246_v25 }
 0x3ea   : > { %1486 = vmatmul.mubr.bf16.vlgmr.msra.gmra.mxu0 %v1245_v26 }
 0x3eb   : > { %2329 = vmatpush3.bf16.msra.mxu0 %v2613_v4 }
 0x3ec   : > { %2330 = vmatprep.subr.bf16.mxu0 %v2614_v5 }
 0x3ef   : > { %2331 = vmatpush3.bf16.msra.mxu0 %v2615_v6 }
 0x3f0   : > { %2332 = vmatprep.subr.bf16.mxu0 %v2616_v7 }
 0x3f3   : > { %2333 = vmatpush3.bf16.msra.mxu0 %v2617_v8 }
 0x3f4   : > { %2334 = vmatprep.subr.bf16.mxu0 %v2618_v9 }
 0x3f7   : > { %2335 = vmatpush3.bf16.msra.mxu0 %v2619_v10 }
 0x3f8   : > { %2336 = vmatprep.subr.bf16.mxu0 %v2620_v16 }
 0x3fb   : > { %2337 = vmatpush3.bf16.msra.mxu0 %v2621_v18 }
 0x3fc   : > { %2338 = vmatprep.subr.bf16.mxu0 %v2622_v19 }
 0x3ff   : > { %2339 = vmatpush3.bf16.msra.mxu0 %v2623_v20 }
 0x400   : > { %2340 = vmatprep.subr.bf16.mxu0 %v2624_v21 }
 0x403   : > { %2341 = vmatpush3.bf16.msra.mxu0 %v2625_v17 }
 0x404   : > { %2342 = vmatprep.subr.bf16.mxu0 %v2626_v22 }
 0x407   : > { %2343 = vmatpush3.bf16.msra.mxu0 %v2627_v23 }
 0x4aa   : > { %v1487_v47 = vpop.f32.mrf.mxu0 }
 0x4ab   : > { %v1488_v48 = vadd.f32 %v1487_v47, %v1286_v45 }
 0x4ac   : > { %v1489_v49 = vpop.f32.mrf.mxu0 }
 0x4ad   : > { %v2184_v50 = vmul.f32 -1.442695, %v1488_v48  ;;  %v1490_v51 = vadd.f32 %v1489_v49, %v1290_v46 }
 0x4ae   : > { %v1491_v52 = vpop.f32.mrf.mxu0 }
 0x4af   : > { %2636 = vpow2.f32 %v2184_v50  ;;  %v2185_v53 = vmul.f32 -1.442695, %v1490_v51 }
 0x4b0   : > { %v1492_v54 = vpop.f32.mrf.mxu0 }
 0x4b1   : > { %2638 = vpow2.f32 %v2185_v53 }
 0x4bc   : > { %v2637_v55 = vpop.eup %2636 }
 0x4bd   : > { %v1500_v56 = vadd.f32 1.0, %v2637_v55 }
 0x4be   : > { %v2639_v57 = vpop.eup %2638 }
 0x4bf   : > { %2640 = vrcp.f32 %v1500_v56  ;;  %v1501_v58 = vadd.f32 1.0, %v2639_v57 }
 0x4c1   : > { %2642 = vrcp.f32 %v1501_v58 }
 0x4cc   : > { %v2641_v59 = vpop.eup %2640 }
 0x4cd   : > { %v1506_v61 = vmul.f32 %v2641_v59, %v1488_v48 }
 0x4ce   : > { %v2643_v60 = vpop.eup %2642 }
 0x4cf   : > { %v1507_v62 = vmul.f32 %v2643_v60, %v1490_v51  ;;  %v1508_v0 = vpack.c.bf16 %v1506_v61, %v1506_v61 }
 0x4d1   : > { %v1509_v63 = vpack.c.bf16 %v1507_v62, %v1507_v62 }
 0x4d3   : > { %1748 = vmatprep.mubr.bf16.mxu1 %v1509_v63 }
 0x4d4   : > { %1749 = vmatmul.mubr.bf16.vlgmr.msra.gmra.mxu1 %v1508_v0 }
 0x594   : > { %v1750_v25 = vpop.f32.mrf.mxu1 }
 0x595   : > { %v1751_v26 = vadd.f32 %v1750_v25, %v1549_v12 }
 0x596   : > { %v1752_v27 = vpop.f32.mrf.mxu1 }
 0x597   : > { %v2251_v28 = vmul.f32 -1.442695, %v1751_v26  ;;  %v1753_v11 = vadd.f32 %v1752_v27, %v1553_v24 }
 0x598   : > { %v1754_v13 = vpop.f32.mrf.mxu1 }
 0x599   : > { %2644 = vpow2.f32 %v2251_v28  ;;  %v2252_v15 = vmul.f32 -1.442695, %v1753_v11 }
 0x59a   : > { %v1755_v29 = vpop.f32.mrf.mxu1 }
 0x59b   : > { %2646 = vpow2.f32 %v2252_v15 }
 0x5a6   : > { %v2645_v30 = vpop.eup %2644 }
 0x5a7   : > { %v1763_v31 = vadd.f32 1.0, %v2645_v30 }
 0x5a8   : > { %v2647_v32 = vpop.eup %2646 }
 0x5a9   : > { %2648 = vrcp.f32 %v1763_v31  ;;  %v1764_v33 = vadd.f32 1.0, %v2647_v32 }
 0x5ab   : > { %2650 = vrcp.f32 %v1764_v33 }
 0x5b6   : > { %v2649_v1 = vpop.eup %2648 }
 0x5b7   : > { %v1769_v3 = vmul.f32 %v2649_v1, %v1751_v26 }
 0x5b8   : > { %v2651_v34 = vpop.eup %2650 }
 0x5b9   : > { %v1770_v35 = vmul.f32 %v2651_v34, %v1753_v11  ;;  %v1771_v37 = vpack.c.bf16 %v1769_v3, %v1769_v3 }
 0x5bb   : > { %v1772_v36 = vpack.c.bf16 %v1770_v35, %v1770_v35 }
 0x5bd   : > { %1933 = vmatprep.mubr.bf16.mxu0 %v1772_v36 }
 0x5be   : > { %1934 = vmatmul.mubr.bf16.vlgmr.msra.gmra.mxu0 %v1771_v37 }
 0x67e   : > { %v2344_v38 = vpop.f32.mrf.mxu0 }
 0x680   : > { %v2345_v39 = vpop.f32.mrf.mxu0 }
 0x681   : > { %v2346_v40 = vadd.f32 %v2345_v39, %v2344_v38 }
 0x682   : > { %v2347_v41 = vpop.f32.mrf.mxu0 }
 0x683   : > { %1941 = vst [vmem:[%s2828_s20] sm:$0xff] %v2346_v40 }
 0x684   : > { %v2348_v42 = vpop.f32.mrf.mxu0 }
 0x685 PF: > { %s30_s25 = sadd.s32 1, %s2716_s25   ;;  %s3326_s1 = smov %s2708_s23 }
 0x686   : > { %p27_p8 = scmp.ge.s32.totalorder %s30_s25, 8   ;;  %s3327_s22 = smov %s2712_s24 }
 0x687   : > { %s3328_s23 = smov %s3331_s26  ;;  %s3329_s24 = smov %s3335_s27 }
 0x688   :  { %29 = sbr.rel (!%p27_p8) target bundleno = 29 (0x1d), region = 104 }

</bundles_post_ra>
